<compile_context>
chip_gen: v7x
topology: tpu7x:2x2x1
jax: 0.10.0
libtpu: 0.0.40
codegen_flags: <defaults>
</compile_context>

<pallas_src>
import jax
import jax.numpy as jnp
from jax import lax
from jax.experimental import pallas as pl
from jax.experimental.pallas import tpu as pltpu

NUM_CLASSES = 35


def _round_up(x, m):
    return ((x + m - 1) // m) * m


def _cdiv(a, b):
    return -(-a // b)


def _vmem_capacity_bytes():
    try:
        return int(pltpu.get_tpu_info().vmem_capacity_bytes)
    except Exception:
        return 64 * 1024 * 1024  # conservative (v7x per-core VMEM)


def _make_f1_kernel(num_classes, c_pad):
    """grid = (pixel-split [parallel], batch [parallel], pixel-tile [reduction])."""

    def kernel(logits_ref, target_ref, out_ref):
        t = pl.program_id(2)

        @pl.when(t == 0)
        def _init():
            out_ref[...] = jnp.zeros(out_ref.shape, out_ref.dtype)

        logits = logits_ref[...]          # (C, TP)  f32 or bf16
        tgt = target_ref[...]             # (1, TP)  int32

        # torch-style argmax over the class (sublane) axis: lowest index wins ties.
        max_v = jnp.max(logits, axis=0, keepdims=True)                     # (1, TP)
        cls_iota = lax.broadcasted_iota(jnp.int32, logits.shape, 0)        # (C, TP)
        pred = jnp.min(jnp.where(logits == max_v, cls_iota, num_classes),
                       axis=0, keepdims=True)                              # (1, TP)

        # bf16 one-hots; class axis padded to a 16-sublane multiple (free for bf16).
        classes = lax.broadcasted_iota(jnp.int32, (c_pad, 1), 0)           # (Cp, 1)
        pred_oh = (pred == classes).astype(jnp.bfloat16)                   # (Cp, TP)
        tgt_oh = (tgt == classes).astype(jnp.bfloat16)                     # (Cp, TP)

        # MXU confusion-matrix accumulation: conf[i, j] = #{pred == i & tgt == j}.
        # Contract the lane (pixel) axis of both operands -> no XLU transpose.
        conf = lax.dot_general(pred_oh, tgt_oh,
                               (((1,), (1,)), ((), ())),
                               preferred_element_type=jnp.float32)         # (Cp, Cp)

        # Per-tile counts <= TP << 2^24, so the f32 -> int32 conversion is exact.
        out_ref[...] += conf.astype(jnp.int32)

    return kernel


def f1_score_pallas(logits, target, num_classes=NUM_CLASSES, max_tile_pixels=None):
    """Macro F1 of argmax(logits, axis=1) vs integer targets.

    logits: (N, C, H, W) float; target: (N, H, W) integer labels in [0, C).
    """
    N, C, H, W = logits.shape
    assert C == num_classes
    P = H * W

    # bf16 logits accepted end-to-end (they are ~97% of HBM traffic); anything
    # else is computed in f32 like the reference.
    if logits.dtype not in (jnp.bfloat16, jnp.float32):
        logits = logits.astype(jnp.float32)
    target = target.astype(jnp.int32)

    # --- tile size / VMEM budget, derived from the actual chip generation -------
    vmem_cap = _vmem_capacity_bytes()
    big_vmem = vmem_cap >= 128 * 1024 * 1024            # v5e / v6e (128 MiB VMEM)
    if max_tile_pixels is None:
        max_tile_pixels = 32768 if big_vmem else 16384  # 64-MiB v7x: smaller tiles
    max_tile_pixels = max(128, _round_up(max_tile_pixels, 128))

    # Balanced tile size (no TP=128 cliff for awkward H*W); prefer an exact
    # divisor of similar size to avoid the wrapper pad copy entirely.
    n_tiles_target = _cdiv(P, max_tile_pixels)
    TP = _round_up(_cdiv(P, n_tiles_target), 128)
    d, best_div = 128, 0
    while d <= min(P, TP):
        if P % d == 0:
            best_div = d
        d += 128
    if best_div >= TP // 2:
        TP = best_div
    n_tiles = _cdiv(P, TP)

    # 2-way pixel split on a leading parallel axis: uses v7x's second TensorCore
    # for batch-1 evaluation; neutral on single-core v5e/v6e.
    n_splits = 2 if (N == 1 and n_tiles >= 2) else 1
    tiles_per_split = _cdiv(n_tiles, n_splits)
    padded_P = n_splits * tiles_per_split * TP

    logits_r = logits.reshape(N, C, P)
    target_r = target.reshape(N, 1, P)
    if padded_P != P:
        pad = padded_P - P
        logits_r = jnp.pad(logits_r, ((0, 0), (0, 0), (0, pad)))
        # Sentinel class >= num_classes: padded pixels only land in confusion
        # rows/cols that the finalize slices away -> no in-kernel masking needed.
        target_r = jnp.pad(target_r, ((0, 0), (0, 0), (0, pad)),
                           constant_values=num_classes)

    c_pad = _round_up(num_classes, 16)   # bf16 sublane tile -> padding is free

    # Explicit VMEM budget: double-buffered inputs + bf16 one-hots + compare temps.
    itemsize = logits_r.dtype.itemsize
    sub_c = _round_up(C, 8)
    vmem_need = (2 * sub_c * TP * itemsize          # logits (double-buffered)
                 + 2 * 8 * TP * 4                   # target (double-buffered)
                 + 2 * c_pad * TP * 2               # bf16 one-hots
                 + 2 * sub_c * TP * 4               # compare / argmax intermediates
                 + 4 * 8 * TP * 4                   # row temps (max_v, pred, ...)
                 + 2 * c_pad * 128 * 4)             # resident confusion block
    vmem_cap_limit = (96 << 20) if big_vmem else (48 << 20)
    vmem_limit = int(min(max(vmem_need * 5 // 4, 32 << 20), vmem_cap_limit))

    grid_spec = pltpu.PrefetchScalarGridSpec(
        num_scalar_prefetch=0,
        grid=(n_splits, N, tiles_per_split),
        in_specs=[
            pl.BlockSpec((None, C, TP),
                         lambda s, n, t: (n, 0, s * tiles_per_split + t)),
            pl.BlockSpec((None, 1, TP),
                         lambda s, n, t: (n, 0, s * tiles_per_split + t)),
        ],
        out_specs=pl.BlockSpec((None, None, c_pad, c_pad),
                               lambda s, n, t: (s, n, 0, 0)),
    )

    counts = pl.pallas_call(
        _make_f1_kernel(num_classes, c_pad),
        grid_spec=grid_spec,
        out_shape=jax.ShapeDtypeStruct((n_splits, N, c_pad, c_pad), jnp.int32),
        compiler_params=pltpu.CompilerParams(
            dimension_semantics=("parallel", "parallel", "arbitrary"),
            vmem_limit_bytes=vmem_limit,
        ),
    )(logits_r, target_r)

    # Tiny finalize in JAX: sum the confusion matrix over splits + batch, slice off
    # the class padding (where padded pixels land), then macro F1 like the reference.
    conf = jnp.sum(counts, axis=(0, 1))[:num_classes, :num_classes].astype(jnp.float32)
    tp = jnp.diagonal(conf)
    pc = jnp.sum(conf, axis=1)    # #{pred == c}
    tc = jnp.sum(conf, axis=0)    # #{target == c}
    fp = pc - tp
    fn = tc - tp
    denom = 2.0 * tp + fp + fn
    f1 = jnp.where(denom > 0.0, 2.0 * tp / jnp.where(denom > 0.0, denom, 1.0), 0.0)
    return jnp.mean(f1)


def _f1_reference(logits, target, num_classes=NUM_CLASSES):
    pred = jnp.argmax(logits, axis=1)                       # (N, H, W)
    cls = jnp.arange(num_classes)
    pred_oh = pred[..., None] == cls                        # (N, H, W, C)
    tgt_oh = target[..., None] == cls
    tp = jnp.sum(pred_oh & tgt_oh, axis=(0, 1, 2)).astype(jnp.float32)
    fp = jnp.sum(pred_oh & ~tgt_oh, axis=(0, 1, 2)).astype(jnp.float32)
    fn = jnp.sum(~pred_oh & tgt_oh, axis=(0, 1, 2)).astype(jnp.float32)
    denom = 2.0 * tp + fp + fn
    f1 = jnp.where(denom > 0, 2.0 * tp / jnp.where(denom > 0, denom, 1.0), 0.0)
    return jnp.mean(f1)


if __name__ == "__main__":
    key = jax.random.PRNGKey(0)
    k1, k2, k3, k4 = jax.random.split(key, 4)

    # Case 1: batch=2, divisible spatial size (no-pad fast path).
    N, C, H, W = 2, NUM_CLASSES, 16, 16
    logits = jax.random.normal(k1, (N, C, H, W), dtype=jnp.float32)
    target = jax.random.randint(k2, (N, H, W), 0, NUM_CLASSES, dtype=jnp.int32)
    f1 = jax.block_until_ready(f1_score_pallas(logits, target))
    f1_ref = jax.block_until_ready(_f1_reference(logits, target))
    assert abs(float(f1) - float(f1_ref)) < 1e-5, (float(f1), float(f1_ref))

    # Case 2: batch=1, awkward spatial size + forced small tile -> exercises the
    # padded-tail sentinel path and the 2-way pixel split used for v7x megacore.
    N2, H2, W2 = 1, 24, 24
    logits2 = jax.random.normal(k3, (N2, C, H2, W2), dtype=jnp.float32)
    target2 = jax.random.randint(k4, (N2, H2, W2), 0, NUM_CLASSES, dtype=jnp.int32)
    f1b = jax.block_until_ready(f1_score_pallas(logits2, target2, max_tile_pixels=256))
    f1b_ref = jax.block_until_ready(_f1_reference(logits2, target2))
    assert abs(float(f1b) - float(f1b_ref)) < 1e-5, (float(f1b), float(f1b_ref))

    print("KERNEL_OK")
</pallas_src>

<mosaic_0001>
module attributes {stable_mosaic.version = 11 : i64} {
  func.func @kernel(%arg0: i32, %arg1: i32, %arg2: i32, %arg3: memref<1x35x256xf32, #tpu.memory_space<vmem>>, %arg4: memref<1x1x256xi32, #tpu.memory_space<vmem>>, %arg5: memref<1x1x48x48xi32, #tpu.memory_space<vmem>>) attributes {dimension_semantics = [#tpu.dimension_semantics<parallel>, #tpu.dimension_semantics<parallel>, #tpu.dimension_semantics<arbitrary>], iteration_bounds = array<i64: 1, 2, 1>, scalar_prefetch = 0 : i64, scratch_operands = 0 : i64, tpu.core_type = #tpu.core_type<tc>, window_params = [{transform_indices = @transform_0, window_bounds = array<i64: 1, 35, 256>}, {transform_indices = @transform_1, window_bounds = array<i64: 1, 1, 256>}, {transform_indices = @transform_2, window_bounds = array<i64: 1, 1, 48, 48>}]} {
    %c0_i32 = arith.constant 0 : i32
    %0 = arith.cmpi eq, %arg2, %c0_i32 : i32
    %1 = arith.extui %0 : i1 to i32
    %c0_i32_0 = arith.constant 0 : i32
    %2 = arith.cmpi ne, %1, %c0_i32_0 : i32
    scf.if %2 {
      %c0_i32_16 = arith.constant 0 : i32
      %37 = vector.broadcast %c0_i32_16 : i32 to vector<48x48xi32>
      %c0_17 = arith.constant 0 : index
      %c0_18 = arith.constant 0 : index
      %c0_19 = arith.constant 0 : index
      %c0_20 = arith.constant 0 : index
      %38 = vector.load %arg5[%c0_17, %c0_18, %c0_19, %c0_20] : memref<1x1x48x48xi32, #tpu.memory_space<vmem>>, vector<1x1x48x48xi32>
      %39 = vector.shape_cast %38 : vector<1x1x48x48xi32> to vector<48x48xi32>
      %40 = vector.shape_cast %37 : vector<48x48xi32> to vector<1x1x48x48xi32>
      tpu.vector_store %arg5[%c0_17, %c0_18, %c0_19, %c0_20], %40 {strides = array<i32>} : memref<1x1x48x48xi32, #tpu.memory_space<vmem>>, vector<1x1x48x48xi32>,
    } else {
    }
    %c0 = arith.constant 0 : index
    %c0_1 = arith.constant 0 : index
    %c0_2 = arith.constant 0 : index
    %3 = vector.load %arg3[%c0, %c0_1, %c0_2] : memref<1x35x256xf32, #tpu.memory_space<vmem>>, vector<1x35x256xf32>
    %4 = vector.shape_cast %3 : vector<1x35x256xf32> to vector<35x256xf32>
    %c0_3 = arith.constant 0 : index
    %c0_4 = arith.constant 0 : index
    %c0_5 = arith.constant 0 : index
    %5 = vector.load %arg4[%c0_3, %c0_4, %c0_5] : memref<1x1x256xi32, #tpu.memory_space<vmem>>, vector<1x1x256xi32>
    %6 = vector.shape_cast %5 : vector<1x1x256xi32> to vector<1x256xi32>
    %cst = arith.constant dense<0xFF800000> : vector<256xf32>
    %7 = vector.multi_reduction <maximumf>, %4, %cst [0] : vector<35x256xf32> to vector<256xf32>
    %8 = vector.shape_cast %7 : vector<256xf32> to vector<1x256xf32>
    %9 = tpu.iota {dimensions = array<i32: 0>} : vector<35x256xi32>
    %10 = vector.broadcast %8 : vector<1x256xf32> to vector<35x256xf32>
    %11 = arith.cmpf oeq, %4, %10 : vector<35x256xf32>
    %c35_i32 = arith.constant 35 : i32
    %12 = vector.broadcast %c35_i32 : i32 to vector<35x256xi32>
    %13 = arith.select %11, %9, %12 : vector<35x256xi1>, vector<35x256xi32>
    %cst_6 = arith.constant dense<2147483647> : vector<256xi32>
    %14 = vector.multi_reduction <minsi>, %13, %cst_6 [0] : vector<35x256xi32> to vector<256xi32>
    %15 = vector.shape_cast %14 : vector<256xi32> to vector<1x256xi32>
    %16 = tpu.iota {dimensions = array<i32: 0>} : vector<48x1xi32>
    %17 = vector.broadcast %15 : vector<1x256xi32> to vector<48x256xi32>
    %18 = vector.broadcast %16 : vector<48x1xi32> to vector<48x256xi32>
    %19 = arith.cmpi eq, %17, %18 : vector<48x256xi32>
    %20 = arith.extui %19 : vector<48x256xi1> to vector<48x256xi32>
    %21 = arith.sitofp %20 : vector<48x256xi32> to vector<48x256xf32>
    %22 = arith.truncf %21 : vector<48x256xf32> to vector<48x256xbf16>
    %23 = vector.broadcast %6 : vector<1x256xi32> to vector<48x256xi32>
    %24 = vector.broadcast %16 : vector<48x1xi32> to vector<48x256xi32>
    %25 = arith.cmpi eq, %23, %24 : vector<48x256xi32>
    %26 = arith.extui %25 : vector<48x256xi1> to vector<48x256xi32>
    %27 = arith.sitofp %26 : vector<48x256xi32> to vector<48x256xf32>
    %28 = arith.truncf %27 : vector<48x256xf32> to vector<48x256xbf16>
    %cst_7 = arith.constant dense<0.000000e+00> : vector<48x48xf32>
    %29 = tpu.matmul %22, %28, %cst_7 {dimension_numbers = #tpu.dot_dimension_numbers<[1], [1], [0], [0], [0, 0, 1, 0], [], []>} : vector<48x256xbf16>, vector<48x256xbf16>, vector<48x48xf32> -> vector<48x48xf32>
    %c0_8 = arith.constant 0 : index
    %c0_9 = arith.constant 0 : index
    %c0_10 = arith.constant 0 : index
    %c0_11 = arith.constant 0 : index
    %30 = vector.load %arg5[%c0_8, %c0_9, %c0_10, %c0_11] : memref<1x1x48x48xi32, #tpu.memory_space<vmem>>, vector<1x1x48x48xi32>
    %31 = vector.shape_cast %30 : vector<1x1x48x48xi32> to vector<48x48xi32>
    %32 = arith.fptosi %29 : vector<48x48xf32> to vector<48x48xi32>
    %33 = arith.addi %31, %32 : vector<48x48xi32>
    %c0_12 = arith.constant 0 : index
    %c0_13 = arith.constant 0 : index
    %c0_14 = arith.constant 0 : index
    %c0_15 = arith.constant 0 : index
    %34 = vector.load %arg5[%c0_12, %c0_13, %c0_14, %c0_15] : memref<1x1x48x48xi32, #tpu.memory_space<vmem>>, vector<1x1x48x48xi32>
    %35 = vector.shape_cast %34 : vector<1x1x48x48xi32> to vector<48x48xi32>
    %36 = vector.shape_cast %33 : vector<48x48xi32> to vector<1x1x48x48xi32>
    tpu.vector_store %arg5[%c0_12, %c0_13, %c0_14, %c0_15], %36 {strides = array<i32>} : memref<1x1x48x48xi32, #tpu.memory_space<vmem>>, vector<1x1x48x48xi32>,
    return
  }
  func.func @transform_0(%arg0: i32, %arg1: i32, %arg2: i32) -> (i32, i32, i32) {
    %c1_i32 = arith.constant 1 : i32
    %0 = arith.muli %arg0, %c1_i32 : i32
    %1 = arith.addi %0, %arg2 : i32
    %c0_i32 = arith.constant 0 : i32
    %c0_i32_0 = arith.constant 0 : i32
    return %arg1, %c0_i32, %1 : i32, i32, i32
  }
  func.func @transform_1(%arg0: i32, %arg1: i32, %arg2: i32) -> (i32, i32, i32) {
    %c1_i32 = arith.constant 1 : i32
    %0 = arith.muli %arg0, %c1_i32 : i32
    %1 = arith.addi %0, %arg2 : i32
    %c0_i32 = arith.constant 0 : i32
    %c0_i32_0 = arith.constant 0 : i32
    return %arg1, %c0_i32, %1 : i32, i32, i32
  }
  func.func @transform_2(%arg0: i32, %arg1: i32, %arg2: i32) -> (i32, i32, i32, i32) {
    %c0_i32 = arith.constant 0 : i32
    %c0_i32_0 = arith.constant 0 : i32
    %c0_i32_1 = arith.constant 0 : i32
    return %arg0, %arg1, %c0_i32, %c0_i32_0 : i32, i32, i32, i32
  }
}

</mosaic_0001>

<bundles_post_ra>
// kernel: tpu_custom_call.1
= control target key start
LH: loop header
LB: loop body
LE: loop exit
PB: predicated region body
PF: predicated region fallthrough
CT: control target
= control target key end

     0   :  { %7 = vsyncpa [#allocation3], 0  ;;  %s1130_s0 = inlined_call_operand.vmem [shape: f32[2,35,256], index: 0, kind: input, shape index: {}]   ;;  %s1131_s1 = inlined_call_operand.vmem [shape: s32[2,1,256], index: 1, kind: input, shape index: {}]   ;;  %s1132_s2 = inlined_call_operand.hbm [shape: s32[1,2,48,48], index: 2, kind: output, shape index: {}]  }
   0x1   :  { %9 = vsyncpa [#allocation3 + $0x1], 0  ;;  %s860_s9 = smov 0   ;;  %s862_s10 = smov 0  }
   0x2   :  { %s864_s11 = smov 0   ;;  %s866_s12 = smov 0  }
   0x3   :  { %s868_s13 = smov 0   ;;  %s870_s14 = smov 0  }
   0x4 LB: > { %s622_s15 = sadd.s32 4294967295, %s838_s14   ;;  %s623_s16 = sadd.s32 4294967294, %s838_s14   ;;  %s838_s14 = sphi %s870_s14, %s15_s14   ;;  %s834_s13 = sphi %s868_s13, %s1139_s13   ;;  %s830_s12 = sphi %s866_s12, %s1138_s12   ;;  %s826_s11 = sphi %s864_s11, %s1137_s11   ;;  %s822_s10 = sphi %s862_s10, %s1136_s10   ;;  %s818_s9 = sphi %s860_s9, %s1135_s9  }
   0x5   : > { %s30_s17 = sadd.s32 1, %s834_s13  ;;  %s103_s18 = sadd.s32 1, %s826_s11 }
   0x6   : > { %p32_p0 = scmp.ge.s32.totalorder %s30_s17, 2  ;;  %p113_p1 = scmp.ne.s32.totalorder %s826_s11, %s822_s10 }
   0x7   : > { %p114_p2 = scmp.eq.s32.totalorder %s622_s15, 1  ;;  %p119_p3 = scmp.ne.s32.totalorder %s822_s10, %s818_s9 }
   0x8   : > { %s1141_s17 = smov (%p32_p0, %s30_s17), 0  ;;  %p120_p5 = scmp.eq.s32.totalorder %s623_s16, 1 }
   0x9   : > { %p900_p4 = por %p114_p2, %p113_p1  ;;  %s99_s20 = ssub.s32 %s834_s13, %s1141_s17 }
   0xa   : > { %p626_p6 = scmp.ge.s32.totalorder %s838_s14, 1  ;;  %p101_p7 = scmp.eq.s32.totalorder %s99_s20, 0 }
   0xb   : > { %p907_p8 = por %p120_p5, %p119_p3  ;;  %p167_p9 = scmp.lt.s32.totalorder %s838_s14, 3 }
   0xc   : > { %s913_s22 = scalar_select %p101_p7, %s826_s11, %s103_s18  }
   0xd   : > { %p168_p10 = pnand %p626_p6, %p167_p9 }
   0xe   : > { %p205_p11 = scmp.lt.s32.totalorder (!%p168_p10), %s830_s12, 1  ;;  %v272_v0 = vlaneseq (!%p168_p10)  ;;  %s200_s23 = sand.u32 (!%p168_p10), 1, %s822_s10   ;;  %vm231_vm0 = vcmask (!%p168_p10), 392192   ;;  %v840_v4 = vmov (!%p168_p10), 0   ;;  %vm251_vm1 = vcmask (!%p168_p10), 1042432  }
   0xf   : > { %171 = sbr.rel (%p168_p10) target bundleno = 317 (0x13d), region = 28  ;;  %v841_v22 = vmov (!%p168_p10), 1.0|1.0  }
  0x10   : > { %s686_s24 = smul.u32 (!%p168_p10), 48, %s200_s23  ;;  %v920_v1 = vshrl.u32 (!%p168_p10), %v272_v0, 7 }
  0x11   : > { %s700_s7 = smul.u32 (!%p168_p10), 768, %s830_s12 }
  0x12   : > { %v383_v2 = vsub.s32 (!%p168_p10), 1, %v920_v1  ;;  %v379_v3 = vsub.s32 (!%p168_p10), 0, %v920_v1  ;;  %s924_s28 = scalar_lea.vmem (!%p168_p10), [#allocation2], %s686_s24  ;;  %v942_v5 = vadd.s32 (!%p168_p10), 8, %v920_v1  ;;  %v952_v11 = vadd.s32 (!%p168_p10), 16, %v920_v1  ;;  %s842_s24 = smov (!%p168_p10), [#allocation2]  }
  0x13   : > { %234 = vst.msk [vmem:[%s924_s28 + $0x10] sm:$0xff] (!%p168_p10), %vm231_vm0, %v840_v4  ;;  %232 = vst.msk [vmem:[%s924_s28] sm:$0xff] (!%p168_p10), %vm231_vm0, %v840_v4  ;;  %v955_v12 = vadd.s32 (!%p168_p10), 24, %v920_v1  ;;  %v984_v23 = vadd.s32 (!%p168_p10), 40, %v920_v1  ;;  %v997_v28 = vadd.s32 (!%p168_p10), 32, %v920_v1  ;;  %s525_s8 = sshll.u32 (!%p168_p10), %s924_s28, 4  ;;  %s1074_s18 = scalar_lea.hbm (!%p168_p10), %s1132_s2, %s700_s7  ;;  %s1076_s8 = int_to_ptr.vmem [resolvable:$true] %s525_s8 }
  0x14   : > { %233 = vst.msk [vmem:[%s924_s28 + $0x8] sm:$0xff] (!%p168_p10), %vm231_vm0, %v840_v4  ;;  %235 = vst.msk [vmem:[%s924_s28 + $0x18] sm:$0xff] (!%p168_p10), %vm231_vm0, %v840_v4  ;;  %s760_s20 = scalar_lea.vmem (!%p168_p10), %s1076_s8, 768 }
  0x15   : > { %236 = vst.msk [vmem:[%s924_s28 + $0x20] sm:$0xff] (!%p168_p10), %vm231_vm0, %v840_v4  ;;  %237 = vst.msk [vmem:[%s924_s28 + $0x28] sm:$0xff] (!%p168_p10), %vm231_vm0, %v840_v4  ;;  %p761_p12 = scmp.ne.s32.totalorder (!%p168_p10), %s1076_s8, %s760_s20 }
  0x16   : > { %s206_s25 = scalar_select %p205_p11, %s830_s12, 1 }
  0x17   : > { %s1084_s12 = scalar_lea.sflag [#allocation3], %s200_s23  ;;  %p762_p13 = pnand %p761_p12, %p900_p4 }
  0x18   : > { %s687_s26 = smul.u32 80, %s206_s25  ;;  %s628_s27 = sshll.u32 %s206_s25, 1 }
  0x19   : > { %s223_s3 = scalar_lea.vmem %s1131_s1, %s628_s27  ;;  %p763_p0 = pneg %p762_p13 }
  0x1a   : > { %s212_s6 = scalar_lea.vmem %s1130_s0, %s687_s26  ;;  %v248_v6 = vld [vmem:[%s223_s3] sm:$0x3]  ;;  %s764_s25 = sshll.u32 %s842_s24, 4  ;;  %s765_s25 = int_to_ptr.vmem [resolvable:$false] %s764_s25 }
  0x1b   : > { %v384_v7 = vrot.slane %v248_v6, %v383_v2  ;;  %v380_v8 = vrot.slane %v248_v6, %v379_v3  ;;  %v947_v9 = vld [vmem:[%s212_s6 + $0x8] sm:$0xff]  ;;  %v957_v13 = vld [vmem:[%s212_s6 + $0x18] sm:$0xff]  ;;  %v969_v17 = vld [vmem:[%s212_s6] sm:$0xff]  ;;  %s766_s26 = scalar_lea.vmem %s765_s25, 1536  ;;  %p767_p1 = scmp.lt.s32.totalorder %s1076_s8, %s765_s25 }
  0x1c   : > { %v949_v10 = vld [vmem:[%s212_s6 + $0x28] sm:$0xff]  ;;  %v959_v14 = vld [vmem:[%s212_s6 + $0x38] sm:$0xff]  ;;  %v971_v18 = vld [vmem:[%s212_s6 + $0x10] sm:$0xff]  ;;  %p768_p2 = scmp.lt.s32.totalorder %s766_s26, %s760_s20 }
  0x1d   : > { %v961_v15 = vld [vmem:[%s212_s6 + $0x48] sm:$0x7]  ;;  %v261_v16 = vmax.f32 %v947_v9, %v949_v10  ;;  %vm386_vm2 = vcmp.eq.s32.totalorder %v384_v7, %v920_v1  ;;  %vm388_vm3 = vcmp.eq.s32.totalorder %v384_v7, %v942_v5  ;;  %vm385_vm4 = vcmp.eq.s32.totalorder %v380_v8, %v920_v1  ;;  %v973_v19 = vld [vmem:[%s212_s6 + $0x20] sm:$0xff]  ;;  %v977_v20 = vld [vmem:[%s212_s6 + $0x30] sm:$0xff] }
  0x1e   : > { %vm387_vm5 = vcmp.eq.s32.totalorder %v380_v8, %v942_v5  ;;  %vm653_vm6 = vmpackc.low %vm388_vm3, %vm386_vm2  ;;  %vm390_vm7 = vcmp.eq.s32.totalorder %v384_v7, %v952_v11  ;;  %vm392_vm8 = vcmp.eq.s32.totalorder %v384_v7, %v955_v12  ;;  %v979_v21 = vld [vmem:[%s212_s6 + $0x40] sm:$0x7]  ;;  %v263_v24 = vsel %vm251_vm1, %v961_v15, -inf  ;;  %p769_p3 = por %p768_p2, %p767_p1 }
  0x1f   : > { %680 = vmatprep.subr.msk.bf16.mxu1 %vm653_vm6, %v841_v22  ;;  %vm655_vm9 = vmpackc.low %vm387_vm5, %vm385_vm4  ;;  %654 = vmatprep.subr.msk.bf16.mxu0 %vm653_vm6, %v841_v22  ;;  %v262_v25 = vmax.f32 %v957_v13, %v959_v14  ;;  %v264_v26 = vmax.f32 %v261_v16, %v263_v24  ;;  %v252_v27 = vsel %vm251_vm1, %v979_v21, -inf  ;;  %v249_v29 = vmax.f32 %v969_v17, %v973_v19 }
  0x20   : > { %683 = vmatpush1.bf16.xpose.msk.msra.mxu1 %vm655_vm9, %v841_v22  ;;  %656 = vmatpush1.bf16.xpose.msk.msra.mxu0 %vm655_vm9, %v841_v22  ;;  %vm657_vm10 = vmpackc.low %vm392_vm8, %vm390_vm7  ;;  %v250_v30 = vmax.f32 %v971_v18, %v977_v20  ;;  %vm389_vm11 = vcmp.eq.s32.totalorder %v380_v8, %v952_v11  ;;  %vm391_vm12 = vcmp.eq.s32.totalorder %v380_v8, %v955_v12  ;;  %p770_p5 = pnand %p769_p3, %p763_p0 }
  0x21   : > { %681 = vmatprep.subr.msk.bf16.mxu1 %vm657_vm10, %v841_v22  ;;  %658 = vmatprep.subr.msk.bf16.mxu0 %vm657_vm10, %v841_v22  ;;  %v265_v31 = vmax.f32 %v264_v26, %v262_v25  ;;  %vm394_vm13 = vcmp.eq.s32.totalorder %v384_v7, %v997_v28  ;;  %vm396_vm14 = vcmp.eq.s32.totalorder %v384_v7, %v984_v23  ;;  %vm659_vm15 = vmpackc.low %vm391_vm12, %vm389_vm11 }
  0x22   : > { %v253_v32 = vmax.f32 %v249_v29, %v252_v27  ;;  %vm661_vm2 = vmpackc.low %vm396_vm14, %vm394_vm13  ;;  %vm393_vm3 = vcmp.eq.s32.totalorder %v380_v8, %v997_v28  ;;  %vm395_vm4 = vcmp.eq.s32.totalorder %v380_v8, %v984_v23  ;;  %v484_v27 = vld [vmem:[%s924_s28] sm:$0xff] }
  0x23   : > { %v266_v33 = vrot.slane %v265_v31, 4  ;;  %vm663_vm5 = vmpackc.low %vm395_vm4, %vm393_vm3 }
  0x24   : > { %v254_v34 = vmax.f32 %v253_v32, %v250_v30 }
  0x25   : > { %v267_v35 = vmax.f32 %v265_v31, %v266_v33  ;;  %v485_v33 = vld [vmem:[%s924_s28 + $0x8] sm:$0xff] }
  0x26   : > { %v255_v36 = vrot.slane %v254_v34, 4 }
  0x27   : > { %v268_v37 = vrot.slane %v267_v35, 2 }
  0x28   : > { %684 = vmatpush1.bf16.xpose.msk.msra.mxu1 %vm659_vm15, %v841_v22  ;;  %660 = vmatpush1.bf16.xpose.msk.msra.mxu0 %vm659_vm15, %v841_v22  ;;  %v256_v38 = vmax.f32 %v254_v34, %v255_v36 }
  0x29   : > { %682 = vmatprep.subr.msk.bf16.mxu1 %vm661_vm2, %v841_v22  ;;  %662 = vmatprep.subr.msk.bf16.mxu0 %vm661_vm2, %v841_v22  ;;  %v269_v39 = vmax.f32 %v267_v35, %v268_v37 }
  0x2a   : > { %v257_v40 = vrot.slane %v256_v38, 2 }
  0x2b   : > { %v270_v41 = vrot.slane %v269_v39, 1 }
  0x2c   : > { %v258_v42 = vmax.f32 %v256_v38, %v257_v40 }
  0x2d   : > { %v271_v43 = vmax.f32 %v269_v39, %v270_v41  ;;  %v488_v41 = vld [vmem:[%s924_s28 + $0x20] sm:$0xff] }
  0x2e   : > { %v259_v44 = vrot.slane %v258_v42, 1 }
  0x2f   : > { %vm279_vm6 = vcmp.eq.f32.partialorder %v947_v9, %v271_v43  ;;  %vm281_vm7 = vcmp.eq.f32.partialorder %v957_v13, %v271_v43  ;;  %vm283_vm8 = vcmp.eq.f32.partialorder %v949_v10, %v271_v43  ;;  %vm285_vm9 = vcmp.eq.f32.partialorder %v959_v14, %v271_v43 }
  0x30   : > { %685 = vmatpush1.bf16.xpose.msk.msra.mxu1 %vm663_vm5, %v841_v22  ;;  %664 = vmatpush1.bf16.xpose.msk.msra.mxu0 %vm663_vm5, %v841_v22  ;;  %vm287_vm10 = vcmp.eq.f32.partialorder %v961_v15, %v271_v43  ;;  %v289_v45 = vsel %vm279_vm6, %v920_v1, 35  ;;  %v291_v46 = vsel %vm281_vm7, %v942_v5, 35  ;;  %v293_v47 = vsel %vm283_vm8, %v952_v11, 35 }
  0x31   : > { %v295_v48 = vsel %vm285_vm9, %v955_v12, 35  ;;  %v297_v49 = vsel %vm287_vm10, %v997_v28, 35  ;;  %v260_v50 = vmax.f32 %v258_v42, %v259_v44  ;;  %vm316_vm11 = vcmp.lt.s32.totalorder %v289_v45, %v293_v47 }
  0x32   : > { %vm318_vm12 = vcmp.lt.s32.totalorder %v291_v46, %v295_v48  ;;  %v320_v51 = vsel %vm251_vm1, %v297_v49, 2147483647  ;;  %v317_v52 = vsel %vm316_vm11, %v289_v45, %v293_v47 }
  0x33   : > { %v319_v53 = vsel %vm318_vm12, %v291_v46, %v295_v48  ;;  %vm278_vm13 = vcmp.eq.f32.partialorder %v969_v17, %v260_v50  ;;  %vm280_vm14 = vcmp.eq.f32.partialorder %v971_v18, %v260_v50  ;;  %vm321_vm15 = vcmp.lt.s32.totalorder %v317_v52, %v320_v51  ;;  %v486_v18 = vld [vmem:[%s924_s28 + $0x10] sm:$0xff]  ;;  %v489_v46 = vld [vmem:[%s924_s28 + $0x28] sm:$0xff] }
  0x34   : > { %vm282_vm2 = vcmp.eq.f32.partialorder %v973_v19, %v260_v50  ;;  %vm284_vm3 = vcmp.eq.f32.partialorder %v977_v20, %v260_v50  ;;  %vm286_vm4 = vcmp.eq.f32.partialorder %v979_v21, %v260_v50  ;;  %v322_v54 = vsel %vm321_vm15, %v317_v52, %v320_v51 }
  0x35   : > { %v288_v55 = vsel %vm278_vm13, %v920_v1, 35  ;;  %v290_v56 = vsel %vm280_vm14, %v942_v5, 35  ;;  %v292_v57 = vsel %vm282_vm2, %v952_v11, 35  ;;  %vm323_vm5 = vcmp.lt.s32.totalorder %v322_v54, %v319_v53 }
  0x36   : > { %v294_v58 = vsel %vm284_vm3, %v955_v12, 35  ;;  %v296_v59 = vsel %vm286_vm4, %v997_v28, 35  ;;  %vm298_vm6 = vcmp.lt.s32.totalorder %v288_v55, %v292_v57  ;;  %v324_v60 = vsel %vm323_vm5, %v322_v54, %v319_v53 }
  0x37   : > { %v299_v61 = vsel %vm298_vm6, %v288_v55, %v292_v57  ;;  %vm300_vm7 = vcmp.lt.s32.totalorder %v290_v56, %v294_v58  ;;  %v302_v62 = vsel %vm251_vm1, %v296_v59, 2147483647  ;;  %v325_v63 = vrot.slane %v324_v60, 4 }
  0x38   : > { %v301_v0 = vsel %vm300_vm7, %v290_v56, %v294_v58  ;;  %vm303_vm8 = vcmp.lt.s32.totalorder %v299_v61, %v302_v62 }
  0x39   : > { %v304_v2 = vsel %vm303_vm8, %v299_v61, %v302_v62  ;;  %vm326_vm9 = vcmp.lt.s32.totalorder %v324_v60, %v325_v63 }
  0x3a   : > { %vm305_vm10 = vcmp.lt.s32.totalorder %v304_v2, %v301_v0  ;;  %v327_v3 = vsel %vm326_vm9, %v324_v60, %v325_v63 }
  0x3b   : > { %v306_v4 = vsel %vm305_vm10, %v304_v2, %v301_v0  ;;  %v328_v6 = vrot.slane %v327_v3, 2 }
  0x3c   : > { %v307_v7 = vrot.slane %v306_v4, 4 }
  0x3d   : > { %vm329_vm11 = vcmp.lt.s32.totalorder %v327_v3, %v328_v6 }
  0x3e   : > { %vm308_vm12 = vcmp.lt.s32.totalorder %v306_v4, %v307_v7  ;;  %v330_v8 = vsel %vm329_vm11, %v327_v3, %v328_v6 }
  0x3f   : > { %v309_v9 = vsel %vm308_vm12, %v306_v4, %v307_v7  ;;  %v331_v10 = vrot.slane %v330_v8, 1 }
  0x40   : > { %v310_v13 = vrot.slane %v309_v9, 2 }
  0x41   : > { %vm332_vm13 = vcmp.lt.s32.totalorder %v330_v8, %v331_v10 }
  0x42   : > { %vm311_vm14 = vcmp.lt.s32.totalorder %v309_v9, %v310_v13  ;;  %v333_v14 = vsel %vm332_vm13, %v330_v8, %v331_v10 }
  0x43   : > { %v312_v15 = vsel %vm311_vm14, %v309_v9, %v310_v13  ;;  %vm340_vm1 = vcmp.eq.s32.totalorder %v333_v14, %v952_v11  ;;  %vm342_vm15 = vcmp.eq.s32.totalorder %v333_v14, %v955_v12  ;;  %vm336_vm2 = vcmp.eq.s32.totalorder %v333_v14, %v920_v1 }
  0x44   : > { %v313_v16 = vrot.slane %v312_v15, 1  ;;  %vm669_vm3 = vmpackc.low %vm342_vm15, %vm340_vm1  ;;  %vm338_vm4 = vcmp.eq.s32.totalorder %v333_v14, %v942_v5  ;;  %vm344_vm5 = vcmp.eq.s32.totalorder %v333_v14, %v997_v28  ;;  %vm346_vm6 = vcmp.eq.s32.totalorder %v333_v14, %v984_v23 }
  0x45   : > { %670 = vmatprep.mubr.msk.bf16.mxu1 %vm669_vm3, %v841_v22  ;;  %vm665_vm8 = vmpackc.low %vm338_vm4, %vm336_vm2 }
  0x46   : > { %vm314_vm7 = vcmp.lt.s32.totalorder %v312_v15, %v313_v16  ;;  %666 = vmatprep.mubr.msk.bf16.mxu0 %vm665_vm8, %v841_v22  ;;  %vm673_vm13 = vmpackc.low %vm346_vm6, %vm344_vm5 }
  0x47   : > { %v315_v17 = vsel %vm314_vm7, %v312_v15, %v313_v16 }
  0x48   : > { %vm339_vm9 = vcmp.eq.s32.totalorder %v315_v17, %v952_v11  ;;  %vm341_vm10 = vcmp.eq.s32.totalorder %v315_v17, %v955_v12  ;;  %vm335_vm11 = vcmp.eq.s32.totalorder %v315_v17, %v920_v1  ;;  %vm337_vm12 = vcmp.eq.s32.totalorder %v315_v17, %v942_v5 }
  0x49   : > { %vm671_vm14 = vmpackc.low %vm341_vm10, %vm339_vm9  ;;  %vm343_vm15 = vcmp.eq.s32.totalorder %v315_v17, %v997_v28  ;;  %vm345_vm2 = vcmp.eq.s32.totalorder %v315_v17, %v984_v23  ;;  %v487_v28 = vld [vmem:[%s924_s28 + $0x18] sm:$0xff] }
  0x4a   : > { %672 = vmatmul.mubr.msk.bf16.vlgmr.msra.gmra.mrb[0].mxu1 %vm671_vm14, %v841_v22  ;;  %vm667_vm1 = vmpackc.low %vm337_vm12, %vm335_vm11 }
  0x4b   : > { %668 = vmatmul.mubr.msk.bf16.vlgmr.msra.gmra.mrb[0].mxu0 %vm667_vm1, %v841_v22  ;;  %674 = vmatprep.mubr.msk.bf16.mxu1 %vm673_vm13, %v841_v22  ;;  %vm675_vm3 = vmpackc.low %vm345_vm2, %vm343_vm15 }
  0x52   : > { %676 = vmatmul.mubr.msk.bf16.gmra.mrb[4].mxu1 %vm675_vm3, %v841_v22 }
 0x11d   : > { %v469_v1 = vpop.f32.mrb[0].mxu1 }
 0x11e   : > { %v692_v5 = vtrunc.f32 %v469_v1  ;;  %v471_v11 = vpop.f32.mrb[1].mxu1  ;;  %v461_v12 = vpop.f32.mrb[0].mxu0 }
 0x11f   : > { %v472_v19 = vpop.f32.mrb[2].mxu1  ;;  %v688_v20 = vtrunc.f32 %v461_v12  ;;  %v463_v21 = vpop.f32.mrb[1].mxu0 }
 0x120   : > { %v693_v24 = vcvt.f32.s32 %v692_v5  ;;  %v694_v25 = vtrunc.f32 %v472_v19  ;;  %v474_v26 = vpop.f32.mrb[3].mxu1  ;;  %v464_v23 = vpop.f32.mrb[2].mxu0 }
 0x121   : > { %v689_v29 = vcvt.f32.s32 %v688_v20  ;;  %v690_v22 = vtrunc.f32 %v464_v23  ;;  %v466_v30 = vpop.f32.mrb[3].mxu0 }
 0x122   : > { %v498_v31 = vadd.s32 %v693_v24, %v486_v18  ;;  %v695_v32 = vcvt.f32.s32 %v694_v25 }
 0x123   : > { %v496_v34 = vadd.s32 %v689_v29, %v484_v27  ;;  %v691_v35 = vcvt.f32.s32 %v690_v22 }
 0x124   : > { %505 = vst.msk [vmem:[%s924_s28 + $0x10] sm:$0xff] %vm231_vm0, %v498_v31  ;;  %v499_v36 = vadd.s32 %v695_v32, %v487_v28 }
 0x125   : > { %503 = vst.msk [vmem:[%s924_s28] sm:$0xff] %vm231_vm0, %v496_v34  ;;  %v497_v37 = vadd.s32 %v691_v35, %v485_v33  ;;  %v477_v38 = vpop.f32.mrb[4].mxu1 }
 0x126   : > { %506 = vst.msk [vmem:[%s924_s28 + $0x18] sm:$0xff] %vm231_vm0, %v499_v36  ;;  %v696_v39 = vtrunc.f32 %v477_v38  ;;  %v479_v40 = vpop.f32.mrb[5].mxu1 }
 0x127   : > { %504 = vst.msk [vmem:[%s924_s28 + $0x8] sm:$0xff] %vm231_vm0, %v497_v37  ;;  %v480_v42 = vpop.f32.mrb[6].mxu1 }
 0x128   : > { %v697_v43 = vcvt.f32.s32 %v696_v39  ;;  %v698_v44 = vtrunc.f32 %v480_v42  ;;  %v482_v45 = vpop.f32.mrb[7].mxu1 }
 0x12a   : > { %v500_v47 = vadd.s32 %v697_v43, %v488_v41  ;;  %v699_v48 = vcvt.f32.s32 %v698_v44 }
 0x12c   : > { %507 = vst.msk [vmem:[%s924_s28 + $0x20] sm:$0xff] %vm231_vm0, %v500_v47  ;;  %v501_v49 = vadd.s32 %v699_v48, %v489_v46 }
 0x12e   : > { %508 = vst.msk [vmem:[%s924_s28 + $0x28] sm:$0xff] %vm231_vm0, %v501_v49 }
 0x12f   : > { %773 = shalt.err (!%p770_p5)
}
 0x130   : > { %s774_s23 = scalar_lea.hbm %s1074_s18, 768  ;;  %s778_s29 = scalar_lea.hbm %s1132_s2, 1536 }
 0x131   : > { %p775_p6 = scmp.ne.s32.totalorder %s1074_s18, %s774_s23  ;;  %p779_p10 = scmp.lt.u32.totalorder %s1074_s18, %s1132_s2 }
 0x132   : > { %p780_p11 = scmp.lt.u32.totalorder %s778_s29, %s774_s23  ;;  %p782_p13 = scmp.lt.u32.totalorder %s774_s23, %s1074_s18 }
 0x133   : > { %p776_p7 = pnand %p775_p6, %p900_p4 }
 0x134   : > { %p781_p12 = por %p780_p11, %p779_p10 }
 0x135   : > { %p777_p9 = pneg %p776_p7 }
 0x136   : > { %p783_p0 = por %p782_p13, %p781_p12 }
 0x138   : > { %p784_p1 = pnand %p783_p0, %p777_p9 }
 0x13a   : > { %787 = shalt.err (!%p784_p1)
}
 0x13b   : > { %s843_s4 = smov 128   ;;  %s844_s5 = smov 8  }
 0x13c   : > { %701 = dma.vmem_to_hbm [thread:$0]  (%p900_p4), %s1076_s8, 768, %s1074_s18, %s1084_s12, %s843_s4, %s843_s4, %s844_s5  }
 0x13d PF: > { %p707_p2 = scmp.ge.s32.totalorder %s838_s14, 2  ;;  %s540_s6 = sand.u32 1, %s818_s9  }
 0x13e   : > { %s541_s7 = scalar_lea.sflag [#allocation3], %s540_s6 }
 0x13f   : > { %p704_p3 = pnand %p707_p2, %p907_p8 }
 0x141   : > { %813 = dma.done.wait (!%p704_p3), %s541_s7, 768  }
 0x142   : > { %815 = vsyncadd (!%p704_p3), %s541_s7, 4294966528  ;;  %s15_s14 = sadd.s32 1, %s838_s14   ;;  %s1135_s9 = smov %s822_s10 }
 0x143   : > { %p12_p5 = scmp.ge.s32.totalorder %s15_s14, 4   ;;  %s1136_s10 = smov %s826_s11 }
 0x144   : > { %s1137_s11 = smov %s913_s22  ;;  %s1138_s12 = smov %s834_s13 }
 0x145   : > { %s1139_s13 = smov %s1141_s17  ;;  %14 = sbr.rel (!%p12_p5) target bundleno = 4 (0x4), region = 70 }
 0x14c   :  { %546 = vsyncpa [#allocation3], 1 }
 0x14d   :  { %548 = vsyncpa [#allocation3 + $0x1], 1 }

</bundles_post_ra>
